<compile_context>
chip_gen: v6e
topology: v6e:2x2x1
jax: 0.10.0
libtpu: 0.0.40
codegen_flags: <defaults>
</compile_context>

<pallas_src>
from collections import namedtuple
from typing import Any, Dict

import numpy as np

import jax
import jax.numpy as jnp
from jax.experimental import pallas as pl
from jax.experimental.pallas import tpu as pltpu

SpatialDims = namedtuple("SpatialDims", ["TWO_D", "THREE_D"])


# ----------------------------- Pallas kernel ------------------------------ #
def _dma_copy_kernel(x_hbm_ref, o_hbm_ref, sem):
    # Pure pass-through: DirectModule.forward has no computation.
    # Single HBM -> HBM DMA of the whole array; no VMEM staging, no grid.
    cp = pltpu.make_async_copy(x_hbm_ref, o_hbm_ref, sem)
    cp.start()
    cp.wait()


@jax.jit  # one compile-cache entry per (shape, dtype)
def _identity_passthrough(x: jnp.ndarray) -> jnp.ndarray:
    """Copy `x` through a single HBM->HBM DMA inside a pallas_call."""
    return pl.pallas_call(
        _dma_copy_kernel,
        out_shape=jax.ShapeDtypeStruct(x.shape, x.dtype),
        in_specs=[pl.BlockSpec(memory_space=pl.ANY)],
        out_specs=pl.BlockSpec(memory_space=pl.ANY),
        scratch_shapes=[pltpu.SemaphoreType.DMA(())],
    )(x)


# ------------------------------ JAX "module" ------------------------------ #
class DirectModuleJAX:
    """JAX/Pallas analogue of DirectModule.

    DirectModule is abstract (its __init__ is @abc.abstractmethod) and its
    forward(sample) body is `pass`.  We mirror the attribute conventions set
    in __init__ and (optionally) route the sample's tensors through an
    identity Pallas DMA kernel, returning the (unchanged) sample.
    """

    def __init__(self, exercise_kernel: bool = True):
        # Attribute conventions exactly as in DirectModule.__init__
        self.coil_dim = 1
        self.spatial_dims = SpatialDims(TWO_D=(2, 3), THREE_D=(3, 4))
        self.complex_dim = -1
        # When False, forward is the true zero-traffic identity (fastest
        # faithful path for a no-op module).
        self.exercise_kernel = exercise_kernel
        # No parameters: the torch.nn.Module side of DirectModule registers none.

    def __repr__(self):
        return (
            f"{self.__class__.__name__}(coil_dim={self.coil_dim}, "
            f"spatial_dims=tuple(len={len(self.spatial_dims)}), "
            f"complex_dim={self.complex_dim})"
        )

    def forward(self, sample: Dict[str, Any]) -> Dict[str, Any]:
        # TODO(synk): DirectModule.forward is `pass` (returns None); we route
        # tensors through an identity Pallas DMA kernel and return the sample
        # so the kernel path is exercised without inventing semantics.
        if not self.exercise_kernel:
            return dict(sample)  # zero HBM traffic: the true identity.

        out = {}
        for key, value in sample.items():
            if isinstance(value, (jnp.ndarray, np.ndarray)):
                arr = jnp.asarray(value)
                if arr.ndim == 0 or arr.size == 0:
                    out[key] = arr  # nothing worth a DMA descriptor
                else:
                    out[key] = _identity_passthrough(arr)
            else:
                # Non-array entries: pass through untouched (identity).
                out[key] = value
        return out

    __call__ = forward


# --------------------------------- main ----------------------------------- #
if __name__ == "__main__":
    key = jax.random.PRNGKey(0)
    k1, k2 = jax.random.split(key)

    batch, coil, height, width, cplx = 2, 4, 16, 16, 2
    # DIRECT-style sample dict: masked k-space + sensitivity maps,
    # layout (batch, coil, height, width, complex) per the module's dims.
    sample = {
        "masked_kspace": jax.random.normal(
            k1, (batch, coil, height, width, cplx), dtype=jnp.float32
        ),
        "sensitivity_map": jax.random.normal(
            k2, (batch, coil, height, width, cplx), dtype=jnp.float32
        ),
    }

    module = DirectModuleJAX(exercise_kernel=True)
    out = module(sample)

    # Block on results and check the pass-through is exact.
    for k, v in out.items():
        jax.block_until_ready(v)

    assert jnp.array_equal(out["masked_kspace"], sample["masked_kspace"])
    assert jnp.array_equal(out["sensitivity_map"], sample["sensitivity_map"])

    print("KERNEL_OK")
</pallas_src>

<mosaic_0001>
module attributes {stable_mosaic.version = 11 : i64} {
  func.func @_dma_copy_kernel(%arg0: memref<2x4x16x16x2xf32, #tpu.memory_space<any>>, %arg1: memref<2x4x16x16x2xf32, #tpu.memory_space<any>>, %arg2: memref<!tpu.dma_semaphore, #tpu.memory_space<semaphore_mem>>) attributes {dimension_semantics = [], scalar_prefetch = 0 : i64, scratch_operands = 1 : i64, tpu.core_type = #tpu.core_type<tc>} {
    tpu.enqueue_dma source(%arg0 : memref<2x4x16x16x2xf32, #tpu.memory_space<any>>) target(%arg1 : memref<2x4x16x16x2xf32, #tpu.memory_space<any>>) target_semaphore(%arg2 : memref<!tpu.dma_semaphore, #tpu.memory_space<semaphore_mem>>)
    tpu.wait_dma2 semaphore(%arg2 : memref<!tpu.dma_semaphore, #tpu.memory_space<semaphore_mem>>) src(%arg0 : memref<2x4x16x16x2xf32, #tpu.memory_space<any>>) dst(%arg1 : memref<2x4x16x16x2xf32, #tpu.memory_space<any>>)
    return
  }
}

</mosaic_0001>

<bundles_post_ra>
// kernel: _identity_passthrough.1
= control target key start
LH: loop header
LB: loop body
LE: loop exit
PB: predicated region body
PF: predicated region fallthrough
CT: control target
= control target key end

     0   :  { %s2128_s0 = inlined_call_operand.vmem [shape: f32[2,4,16,16,2], index: 0, kind: input, shape index: {}]   ;;  %s2129_s1 = inlined_call_operand.vmem [shape: f32[2,4,16,16,2], index: 1, kind: output, shape index: {}]  }
   0x1   :  { %v39_v0 = vld [vmem:[%s2128_s0] sm:$0xff]  ;;  %v41_v1 = vld [vmem:[%s2128_s0 + $0x8] sm:$0xff]  ;;  %v43_v2 = vld [vmem:[%s2128_s0 + $0x10] sm:$0xff] }
   0x2   :  { %40 = vst [vmem:[%s2129_s1] sm:$0xff] %v39_v0  ;;  %42 = vst [vmem:[%s2129_s1 + $0x8] sm:$0xff] %v41_v1  ;;  %v45_v3 = vld [vmem:[%s2128_s0 + $0x18] sm:$0xff]  ;;  %v47_v4 = vld [vmem:[%s2128_s0 + $0x20] sm:$0xff] }
   0x3   :  { %44 = vst [vmem:[%s2129_s1 + $0x10] sm:$0xff] %v43_v2  ;;  %v49_v5 = vld [vmem:[%s2128_s0 + $0x28] sm:$0xff]  ;;  %46 = vst [vmem:[%s2129_s1 + $0x18] sm:$0xff] %v45_v3  ;;  %v51_v6 = vld [vmem:[%s2128_s0 + $0x30] sm:$0xff] }
   0x4   :  { %48 = vst [vmem:[%s2129_s1 + $0x20] sm:$0xff] %v47_v4  ;;  %50 = vst [vmem:[%s2129_s1 + $0x28] sm:$0xff] %v49_v5  ;;  %v53_v7 = vld [vmem:[%s2128_s0 + $0x38] sm:$0xff]  ;;  %v55_v8 = vld [vmem:[%s2128_s0 + $0x40] sm:$0xff] }
   0x5   :  { %52 = vst [vmem:[%s2129_s1 + $0x30] sm:$0xff] %v51_v6  ;;  %54 = vst [vmem:[%s2129_s1 + $0x38] sm:$0xff] %v53_v7  ;;  %v57_v9 = vld [vmem:[%s2128_s0 + $0x48] sm:$0xff]  ;;  %v59_v10 = vld [vmem:[%s2128_s0 + $0x50] sm:$0xff] }
   0x6   :  { %56 = vst [vmem:[%s2129_s1 + $0x40] sm:$0xff] %v55_v8  ;;  %v61_v11 = vld [vmem:[%s2128_s0 + $0x58] sm:$0xff]  ;;  %58 = vst [vmem:[%s2129_s1 + $0x48] sm:$0xff] %v57_v9  ;;  %v63_v12 = vld [vmem:[%s2128_s0 + $0x60] sm:$0xff] }
   0x7   :  { %60 = vst [vmem:[%s2129_s1 + $0x50] sm:$0xff] %v59_v10  ;;  %62 = vst [vmem:[%s2129_s1 + $0x58] sm:$0xff] %v61_v11  ;;  %v65_v13 = vld [vmem:[%s2128_s0 + $0x68] sm:$0xff]  ;;  %v67_v14 = vld [vmem:[%s2128_s0 + $0x70] sm:$0xff] }
   0x8   :  { %64 = vst [vmem:[%s2129_s1 + $0x60] sm:$0xff] %v63_v12  ;;  %66 = vst [vmem:[%s2129_s1 + $0x68] sm:$0xff] %v65_v13  ;;  %v69_v15 = vld [vmem:[%s2128_s0 + $0x78] sm:$0xff]  ;;  %v71_v16 = vld [vmem:[%s2128_s0 + $0x80] sm:$0xff] }
   0x9   :  { %68 = vst [vmem:[%s2129_s1 + $0x70] sm:$0xff] %v67_v14  ;;  %v73_v17 = vld [vmem:[%s2128_s0 + $0x88] sm:$0xff]  ;;  %70 = vst [vmem:[%s2129_s1 + $0x78] sm:$0xff] %v69_v15  ;;  %v75_v18 = vld [vmem:[%s2128_s0 + $0x90] sm:$0xff] }
   0xa   :  { %72 = vst [vmem:[%s2129_s1 + $0x80] sm:$0xff] %v71_v16  ;;  %74 = vst [vmem:[%s2129_s1 + $0x88] sm:$0xff] %v73_v17  ;;  %v77_v19 = vld [vmem:[%s2128_s0 + $0x98] sm:$0xff]  ;;  %v79_v20 = vld [vmem:[%s2128_s0 + $0xa0] sm:$0xff] }
   0xb   :  { %76 = vst [vmem:[%s2129_s1 + $0x90] sm:$0xff] %v75_v18  ;;  %78 = vst [vmem:[%s2129_s1 + $0x98] sm:$0xff] %v77_v19  ;;  %v81_v21 = vld [vmem:[%s2128_s0 + $0xa8] sm:$0xff]  ;;  %v83_v22 = vld [vmem:[%s2128_s0 + $0xb0] sm:$0xff] }
   0xc   :  { %80 = vst [vmem:[%s2129_s1 + $0xa0] sm:$0xff] %v79_v20  ;;  %v85_v23 = vld [vmem:[%s2128_s0 + $0xb8] sm:$0xff]  ;;  %82 = vst [vmem:[%s2129_s1 + $0xa8] sm:$0xff] %v81_v21  ;;  %v87_v24 = vld [vmem:[%s2128_s0 + $0xc0] sm:$0xff] }
   0xd   :  { %84 = vst [vmem:[%s2129_s1 + $0xb0] sm:$0xff] %v83_v22  ;;  %86 = vst [vmem:[%s2129_s1 + $0xb8] sm:$0xff] %v85_v23  ;;  %v89_v25 = vld [vmem:[%s2128_s0 + $0xc8] sm:$0xff]  ;;  %v91_v26 = vld [vmem:[%s2128_s0 + $0xd0] sm:$0xff] }
   0xe   :  { %88 = vst [vmem:[%s2129_s1 + $0xc0] sm:$0xff] %v87_v24  ;;  %90 = vst [vmem:[%s2129_s1 + $0xc8] sm:$0xff] %v89_v25  ;;  %v93_v27 = vld [vmem:[%s2128_s0 + $0xd8] sm:$0xff]  ;;  %v95_v28 = vld [vmem:[%s2128_s0 + $0xe0] sm:$0xff] }
   0xf   :  { %92 = vst [vmem:[%s2129_s1 + $0xd0] sm:$0xff] %v91_v26  ;;  %v97_v29 = vld [vmem:[%s2128_s0 + $0xe8] sm:$0xff]  ;;  %94 = vst [vmem:[%s2129_s1 + $0xd8] sm:$0xff] %v93_v27  ;;  %v99_v30 = vld [vmem:[%s2128_s0 + $0xf0] sm:$0xff] }
  0x10   :  { %96 = vst [vmem:[%s2129_s1 + $0xe0] sm:$0xff] %v95_v28  ;;  %98 = vst [vmem:[%s2129_s1 + $0xe8] sm:$0xff] %v97_v29  ;;  %v101_v31 = vld [vmem:[%s2128_s0 + $0xf8] sm:$0xff]  ;;  %v103_v32 = vld [vmem:[%s2128_s0 + $0x100] sm:$0xff] }
  0x11   :  { %100 = vst [vmem:[%s2129_s1 + $0xf0] sm:$0xff] %v99_v30  ;;  %102 = vst [vmem:[%s2129_s1 + $0xf8] sm:$0xff] %v101_v31  ;;  %v105_v33 = vld [vmem:[%s2128_s0 + $0x108] sm:$0xff]  ;;  %v107_v34 = vld [vmem:[%s2128_s0 + $0x110] sm:$0xff] }
  0x12   :  { %104 = vst [vmem:[%s2129_s1 + $0x100] sm:$0xff] %v103_v32  ;;  %v109_v35 = vld [vmem:[%s2128_s0 + $0x118] sm:$0xff]  ;;  %106 = vst [vmem:[%s2129_s1 + $0x108] sm:$0xff] %v105_v33  ;;  %v111_v36 = vld [vmem:[%s2128_s0 + $0x120] sm:$0xff] }
  0x13   :  { %108 = vst [vmem:[%s2129_s1 + $0x110] sm:$0xff] %v107_v34  ;;  %110 = vst [vmem:[%s2129_s1 + $0x118] sm:$0xff] %v109_v35  ;;  %v113_v37 = vld [vmem:[%s2128_s0 + $0x128] sm:$0xff]  ;;  %v115_v38 = vld [vmem:[%s2128_s0 + $0x130] sm:$0xff] }
  0x14   :  { %112 = vst [vmem:[%s2129_s1 + $0x120] sm:$0xff] %v111_v36  ;;  %114 = vst [vmem:[%s2129_s1 + $0x128] sm:$0xff] %v113_v37  ;;  %v117_v39 = vld [vmem:[%s2128_s0 + $0x138] sm:$0xff]  ;;  %v119_v40 = vld [vmem:[%s2128_s0 + $0x140] sm:$0xff] }
  0x15   :  { %116 = vst [vmem:[%s2129_s1 + $0x130] sm:$0xff] %v115_v38  ;;  %v121_v41 = vld [vmem:[%s2128_s0 + $0x148] sm:$0xff]  ;;  %118 = vst [vmem:[%s2129_s1 + $0x138] sm:$0xff] %v117_v39  ;;  %v123_v42 = vld [vmem:[%s2128_s0 + $0x150] sm:$0xff] }
  0x16   :  { %120 = vst [vmem:[%s2129_s1 + $0x140] sm:$0xff] %v119_v40  ;;  %122 = vst [vmem:[%s2129_s1 + $0x148] sm:$0xff] %v121_v41  ;;  %v125_v43 = vld [vmem:[%s2128_s0 + $0x158] sm:$0xff]  ;;  %v127_v44 = vld [vmem:[%s2128_s0 + $0x160] sm:$0xff] }
  0x17   :  { %124 = vst [vmem:[%s2129_s1 + $0x150] sm:$0xff] %v123_v42  ;;  %126 = vst [vmem:[%s2129_s1 + $0x158] sm:$0xff] %v125_v43  ;;  %v129_v45 = vld [vmem:[%s2128_s0 + $0x168] sm:$0xff]  ;;  %v131_v46 = vld [vmem:[%s2128_s0 + $0x170] sm:$0xff] }
  0x18   :  { %128 = vst [vmem:[%s2129_s1 + $0x160] sm:$0xff] %v127_v44  ;;  %v133_v47 = vld [vmem:[%s2128_s0 + $0x178] sm:$0xff]  ;;  %130 = vst [vmem:[%s2129_s1 + $0x168] sm:$0xff] %v129_v45  ;;  %v135_v48 = vld [vmem:[%s2128_s0 + $0x180] sm:$0xff] }
  0x19   :  { %132 = vst [vmem:[%s2129_s1 + $0x170] sm:$0xff] %v131_v46  ;;  %134 = vst [vmem:[%s2129_s1 + $0x178] sm:$0xff] %v133_v47  ;;  %v137_v49 = vld [vmem:[%s2128_s0 + $0x188] sm:$0xff]  ;;  %v139_v50 = vld [vmem:[%s2128_s0 + $0x190] sm:$0xff] }
  0x1a   :  { %136 = vst [vmem:[%s2129_s1 + $0x180] sm:$0xff] %v135_v48  ;;  %138 = vst [vmem:[%s2129_s1 + $0x188] sm:$0xff] %v137_v49  ;;  %v141_v51 = vld [vmem:[%s2128_s0 + $0x198] sm:$0xff]  ;;  %v143_v52 = vld [vmem:[%s2128_s0 + $0x1a0] sm:$0xff] }
  0x1b   :  { %140 = vst [vmem:[%s2129_s1 + $0x190] sm:$0xff] %v139_v50  ;;  %v145_v53 = vld [vmem:[%s2128_s0 + $0x1a8] sm:$0xff]  ;;  %142 = vst [vmem:[%s2129_s1 + $0x198] sm:$0xff] %v141_v51  ;;  %v147_v54 = vld [vmem:[%s2128_s0 + $0x1b0] sm:$0xff] }
  0x1c   :  { %144 = vst [vmem:[%s2129_s1 + $0x1a0] sm:$0xff] %v143_v52  ;;  %146 = vst [vmem:[%s2129_s1 + $0x1a8] sm:$0xff] %v145_v53  ;;  %v149_v55 = vld [vmem:[%s2128_s0 + $0x1b8] sm:$0xff]  ;;  %v151_v56 = vld [vmem:[%s2128_s0 + $0x1c0] sm:$0xff] }
  0x1d   :  { %148 = vst [vmem:[%s2129_s1 + $0x1b0] sm:$0xff] %v147_v54  ;;  %150 = vst [vmem:[%s2129_s1 + $0x1b8] sm:$0xff] %v149_v55  ;;  %v153_v57 = vld [vmem:[%s2128_s0 + $0x1c8] sm:$0xff]  ;;  %v155_v58 = vld [vmem:[%s2128_s0 + $0x1d0] sm:$0xff] }
  0x1e   :  { %152 = vst [vmem:[%s2129_s1 + $0x1c0] sm:$0xff] %v151_v56  ;;  %v157_v59 = vld [vmem:[%s2128_s0 + $0x1d8] sm:$0xff]  ;;  %154 = vst [vmem:[%s2129_s1 + $0x1c8] sm:$0xff] %v153_v57  ;;  %v159_v60 = vld [vmem:[%s2128_s0 + $0x1e0] sm:$0xff] }
  0x1f   :  { %156 = vst [vmem:[%s2129_s1 + $0x1d0] sm:$0xff] %v155_v58  ;;  %158 = vst [vmem:[%s2129_s1 + $0x1d8] sm:$0xff] %v157_v59  ;;  %v161_v61 = vld [vmem:[%s2128_s0 + $0x1e8] sm:$0xff]  ;;  %v163_v62 = vld [vmem:[%s2128_s0 + $0x1f0] sm:$0xff] }
  0x20   :  { %160 = vst [vmem:[%s2129_s1 + $0x1e0] sm:$0xff] %v159_v60  ;;  %162 = vst [vmem:[%s2129_s1 + $0x1e8] sm:$0xff] %v161_v61  ;;  %v165_v63 = vld [vmem:[%s2128_s0 + $0x1f8] sm:$0xff]  ;;  %v167_v0 = vld [vmem:[%s2128_s0 + $0x200] sm:$0xff] }
  0x21   :  { %164 = vst [vmem:[%s2129_s1 + $0x1f0] sm:$0xff] %v163_v62  ;;  %v169_v1 = vld [vmem:[%s2128_s0 + $0x208] sm:$0xff]  ;;  %166 = vst [vmem:[%s2129_s1 + $0x1f8] sm:$0xff] %v165_v63  ;;  %v171_v2 = vld [vmem:[%s2128_s0 + $0x210] sm:$0xff] }
  0x22   :  { %168 = vst [vmem:[%s2129_s1 + $0x200] sm:$0xff] %v167_v0  ;;  %170 = vst [vmem:[%s2129_s1 + $0x208] sm:$0xff] %v169_v1  ;;  %v173_v3 = vld [vmem:[%s2128_s0 + $0x218] sm:$0xff]  ;;  %v175_v4 = vld [vmem:[%s2128_s0 + $0x220] sm:$0xff] }
  0x23   :  { %172 = vst [vmem:[%s2129_s1 + $0x210] sm:$0xff] %v171_v2  ;;  %174 = vst [vmem:[%s2129_s1 + $0x218] sm:$0xff] %v173_v3  ;;  %v177_v5 = vld [vmem:[%s2128_s0 + $0x228] sm:$0xff]  ;;  %v179_v6 = vld [vmem:[%s2128_s0 + $0x230] sm:$0xff] }
  0x24   :  { %176 = vst [vmem:[%s2129_s1 + $0x220] sm:$0xff] %v175_v4  ;;  %v181_v7 = vld [vmem:[%s2128_s0 + $0x238] sm:$0xff]  ;;  %178 = vst [vmem:[%s2129_s1 + $0x228] sm:$0xff] %v177_v5  ;;  %v183_v8 = vld [vmem:[%s2128_s0 + $0x240] sm:$0xff] }
  0x25   :  { %180 = vst [vmem:[%s2129_s1 + $0x230] sm:$0xff] %v179_v6  ;;  %182 = vst [vmem:[%s2129_s1 + $0x238] sm:$0xff] %v181_v7  ;;  %v185_v9 = vld [vmem:[%s2128_s0 + $0x248] sm:$0xff]  ;;  %v187_v10 = vld [vmem:[%s2128_s0 + $0x250] sm:$0xff] }
  0x26   :  { %184 = vst [vmem:[%s2129_s1 + $0x240] sm:$0xff] %v183_v8  ;;  %186 = vst [vmem:[%s2129_s1 + $0x248] sm:$0xff] %v185_v9  ;;  %v189_v11 = vld [vmem:[%s2128_s0 + $0x258] sm:$0xff]  ;;  %v191_v12 = vld [vmem:[%s2128_s0 + $0x260] sm:$0xff] }
  0x27   :  { %188 = vst [vmem:[%s2129_s1 + $0x250] sm:$0xff] %v187_v10  ;;  %v193_v13 = vld [vmem:[%s2128_s0 + $0x268] sm:$0xff]  ;;  %190 = vst [vmem:[%s2129_s1 + $0x258] sm:$0xff] %v189_v11  ;;  %v195_v14 = vld [vmem:[%s2128_s0 + $0x270] sm:$0xff] }
  0x28   :  { %192 = vst [vmem:[%s2129_s1 + $0x260] sm:$0xff] %v191_v12  ;;  %194 = vst [vmem:[%s2129_s1 + $0x268] sm:$0xff] %v193_v13  ;;  %v197_v15 = vld [vmem:[%s2128_s0 + $0x278] sm:$0xff]  ;;  %v199_v16 = vld [vmem:[%s2128_s0 + $0x280] sm:$0xff] }
  0x29   :  { %196 = vst [vmem:[%s2129_s1 + $0x270] sm:$0xff] %v195_v14  ;;  %198 = vst [vmem:[%s2129_s1 + $0x278] sm:$0xff] %v197_v15  ;;  %v201_v17 = vld [vmem:[%s2128_s0 + $0x288] sm:$0xff]  ;;  %v203_v18 = vld [vmem:[%s2128_s0 + $0x290] sm:$0xff] }
  0x2a   :  { %200 = vst [vmem:[%s2129_s1 + $0x280] sm:$0xff] %v199_v16  ;;  %v205_v19 = vld [vmem:[%s2128_s0 + $0x298] sm:$0xff]  ;;  %202 = vst [vmem:[%s2129_s1 + $0x288] sm:$0xff] %v201_v17  ;;  %v207_v20 = vld [vmem:[%s2128_s0 + $0x2a0] sm:$0xff] }
  0x2b   :  { %204 = vst [vmem:[%s2129_s1 + $0x290] sm:$0xff] %v203_v18  ;;  %206 = vst [vmem:[%s2129_s1 + $0x298] sm:$0xff] %v205_v19  ;;  %v209_v21 = vld [vmem:[%s2128_s0 + $0x2a8] sm:$0xff]  ;;  %v211_v22 = vld [vmem:[%s2128_s0 + $0x2b0] sm:$0xff] }
  0x2c   :  { %208 = vst [vmem:[%s2129_s1 + $0x2a0] sm:$0xff] %v207_v20  ;;  %210 = vst [vmem:[%s2129_s1 + $0x2a8] sm:$0xff] %v209_v21  ;;  %v213_v23 = vld [vmem:[%s2128_s0 + $0x2b8] sm:$0xff]  ;;  %v215_v24 = vld [vmem:[%s2128_s0 + $0x2c0] sm:$0xff] }
  0x2d   :  { %212 = vst [vmem:[%s2129_s1 + $0x2b0] sm:$0xff] %v211_v22  ;;  %v217_v25 = vld [vmem:[%s2128_s0 + $0x2c8] sm:$0xff]  ;;  %214 = vst [vmem:[%s2129_s1 + $0x2b8] sm:$0xff] %v213_v23  ;;  %v219_v26 = vld [vmem:[%s2128_s0 + $0x2d0] sm:$0xff] }
  0x2e   :  { %216 = vst [vmem:[%s2129_s1 + $0x2c0] sm:$0xff] %v215_v24  ;;  %218 = vst [vmem:[%s2129_s1 + $0x2c8] sm:$0xff] %v217_v25  ;;  %v221_v27 = vld [vmem:[%s2128_s0 + $0x2d8] sm:$0xff]  ;;  %v223_v28 = vld [vmem:[%s2128_s0 + $0x2e0] sm:$0xff] }
  0x2f   :  { %220 = vst [vmem:[%s2129_s1 + $0x2d0] sm:$0xff] %v219_v26  ;;  %222 = vst [vmem:[%s2129_s1 + $0x2d8] sm:$0xff] %v221_v27  ;;  %v225_v29 = vld [vmem:[%s2128_s0 + $0x2e8] sm:$0xff]  ;;  %v227_v30 = vld [vmem:[%s2128_s0 + $0x2f0] sm:$0xff] }
  0x30   :  { %224 = vst [vmem:[%s2129_s1 + $0x2e0] sm:$0xff] %v223_v28  ;;  %v229_v31 = vld [vmem:[%s2128_s0 + $0x2f8] sm:$0xff]  ;;  %226 = vst [vmem:[%s2129_s1 + $0x2e8] sm:$0xff] %v225_v29  ;;  %v231_v32 = vld [vmem:[%s2128_s0 + $0x300] sm:$0xff] }
  0x31   :  { %228 = vst [vmem:[%s2129_s1 + $0x2f0] sm:$0xff] %v227_v30  ;;  %230 = vst [vmem:[%s2129_s1 + $0x2f8] sm:$0xff] %v229_v31  ;;  %v233_v33 = vld [vmem:[%s2128_s0 + $0x308] sm:$0xff]  ;;  %v235_v34 = vld [vmem:[%s2128_s0 + $0x310] sm:$0xff] }
  0x32   :  { %232 = vst [vmem:[%s2129_s1 + $0x300] sm:$0xff] %v231_v32  ;;  %234 = vst [vmem:[%s2129_s1 + $0x308] sm:$0xff] %v233_v33  ;;  %v237_v35 = vld [vmem:[%s2128_s0 + $0x318] sm:$0xff]  ;;  %v239_v36 = vld [vmem:[%s2128_s0 + $0x320] sm:$0xff] }
  0x33   :  { %236 = vst [vmem:[%s2129_s1 + $0x310] sm:$0xff] %v235_v34  ;;  %v241_v37 = vld [vmem:[%s2128_s0 + $0x328] sm:$0xff]  ;;  %238 = vst [vmem:[%s2129_s1 + $0x318] sm:$0xff] %v237_v35  ;;  %v243_v38 = vld [vmem:[%s2128_s0 + $0x330] sm:$0xff] }
  0x34   :  { %240 = vst [vmem:[%s2129_s1 + $0x320] sm:$0xff] %v239_v36  ;;  %242 = vst [vmem:[%s2129_s1 + $0x328] sm:$0xff] %v241_v37  ;;  %v245_v39 = vld [vmem:[%s2128_s0 + $0x338] sm:$0xff]  ;;  %v247_v40 = vld [vmem:[%s2128_s0 + $0x340] sm:$0xff] }
  0x35   :  { %244 = vst [vmem:[%s2129_s1 + $0x330] sm:$0xff] %v243_v38  ;;  %246 = vst [vmem:[%s2129_s1 + $0x338] sm:$0xff] %v245_v39  ;;  %v249_v41 = vld [vmem:[%s2128_s0 + $0x348] sm:$0xff]  ;;  %v251_v42 = vld [vmem:[%s2128_s0 + $0x350] sm:$0xff] }
  0x36   :  { %248 = vst [vmem:[%s2129_s1 + $0x340] sm:$0xff] %v247_v40  ;;  %v253_v43 = vld [vmem:[%s2128_s0 + $0x358] sm:$0xff]  ;;  %250 = vst [vmem:[%s2129_s1 + $0x348] sm:$0xff] %v249_v41  ;;  %v255_v44 = vld [vmem:[%s2128_s0 + $0x360] sm:$0xff] }
  0x37   :  { %252 = vst [vmem:[%s2129_s1 + $0x350] sm:$0xff] %v251_v42  ;;  %254 = vst [vmem:[%s2129_s1 + $0x358] sm:$0xff] %v253_v43  ;;  %v257_v45 = vld [vmem:[%s2128_s0 + $0x368] sm:$0xff]  ;;  %v259_v46 = vld [vmem:[%s2128_s0 + $0x370] sm:$0xff] }
  0x38   :  { %256 = vst [vmem:[%s2129_s1 + $0x360] sm:$0xff] %v255_v44  ;;  %258 = vst [vmem:[%s2129_s1 + $0x368] sm:$0xff] %v257_v45  ;;  %v261_v47 = vld [vmem:[%s2128_s0 + $0x378] sm:$0xff]  ;;  %v263_v48 = vld [vmem:[%s2128_s0 + $0x380] sm:$0xff] }
  0x39   :  { %260 = vst [vmem:[%s2129_s1 + $0x370] sm:$0xff] %v259_v46  ;;  %v265_v49 = vld [vmem:[%s2128_s0 + $0x388] sm:$0xff]  ;;  %262 = vst [vmem:[%s2129_s1 + $0x378] sm:$0xff] %v261_v47  ;;  %v267_v50 = vld [vmem:[%s2128_s0 + $0x390] sm:$0xff] }
  0x3a   :  { %264 = vst [vmem:[%s2129_s1 + $0x380] sm:$0xff] %v263_v48  ;;  %266 = vst [vmem:[%s2129_s1 + $0x388] sm:$0xff] %v265_v49  ;;  %v269_v51 = vld [vmem:[%s2128_s0 + $0x398] sm:$0xff]  ;;  %v271_v52 = vld [vmem:[%s2128_s0 + $0x3a0] sm:$0xff] }
  0x3b   :  { %268 = vst [vmem:[%s2129_s1 + $0x390] sm:$0xff] %v267_v50  ;;  %270 = vst [vmem:[%s2129_s1 + $0x398] sm:$0xff] %v269_v51  ;;  %v273_v53 = vld [vmem:[%s2128_s0 + $0x3a8] sm:$0xff]  ;;  %v275_v54 = vld [vmem:[%s2128_s0 + $0x3b0] sm:$0xff] }
  0x3c   :  { %272 = vst [vmem:[%s2129_s1 + $0x3a0] sm:$0xff] %v271_v52  ;;  %v277_v55 = vld [vmem:[%s2128_s0 + $0x3b8] sm:$0xff]  ;;  %274 = vst [vmem:[%s2129_s1 + $0x3a8] sm:$0xff] %v273_v53  ;;  %v279_v56 = vld [vmem:[%s2128_s0 + $0x3c0] sm:$0xff] }
  0x3d   :  { %276 = vst [vmem:[%s2129_s1 + $0x3b0] sm:$0xff] %v275_v54  ;;  %278 = vst [vmem:[%s2129_s1 + $0x3b8] sm:$0xff] %v277_v55  ;;  %v281_v57 = vld [vmem:[%s2128_s0 + $0x3c8] sm:$0xff]  ;;  %v283_v58 = vld [vmem:[%s2128_s0 + $0x3d0] sm:$0xff] }
  0x3e   :  { %280 = vst [vmem:[%s2129_s1 + $0x3c0] sm:$0xff] %v279_v56  ;;  %282 = vst [vmem:[%s2129_s1 + $0x3c8] sm:$0xff] %v281_v57  ;;  %v285_v59 = vld [vmem:[%s2128_s0 + $0x3d8] sm:$0xff]  ;;  %v287_v60 = vld [vmem:[%s2128_s0 + $0x3e0] sm:$0xff] }
  0x3f   :  { %284 = vst [vmem:[%s2129_s1 + $0x3d0] sm:$0xff] %v283_v58  ;;  %v289_v61 = vld [vmem:[%s2128_s0 + $0x3e8] sm:$0xff]  ;;  %286 = vst [vmem:[%s2129_s1 + $0x3d8] sm:$0xff] %v285_v59  ;;  %v291_v62 = vld [vmem:[%s2128_s0 + $0x3f0] sm:$0xff] }
  0x40   :  { %288 = vst [vmem:[%s2129_s1 + $0x3e0] sm:$0xff] %v287_v60  ;;  %290 = vst [vmem:[%s2129_s1 + $0x3e8] sm:$0xff] %v289_v61  ;;  %v293_v63 = vld [vmem:[%s2128_s0 + $0x3f8] sm:$0xff]  ;;  %v295_v0 = vld [vmem:[%s2128_s0 + $0x400] sm:$0xff] }
  0x41   :  { %292 = vst [vmem:[%s2129_s1 + $0x3f0] sm:$0xff] %v291_v62  ;;  %294 = vst [vmem:[%s2129_s1 + $0x3f8] sm:$0xff] %v293_v63  ;;  %v297_v1 = vld [vmem:[%s2128_s0 + $0x408] sm:$0xff]  ;;  %v299_v2 = vld [vmem:[%s2128_s0 + $0x410] sm:$0xff] }
  0x42   :  { %296 = vst [vmem:[%s2129_s1 + $0x400] sm:$0xff] %v295_v0  ;;  %v301_v3 = vld [vmem:[%s2128_s0 + $0x418] sm:$0xff]  ;;  %298 = vst [vmem:[%s2129_s1 + $0x408] sm:$0xff] %v297_v1  ;;  %v303_v4 = vld [vmem:[%s2128_s0 + $0x420] sm:$0xff] }
  0x43   :  { %300 = vst [vmem:[%s2129_s1 + $0x410] sm:$0xff] %v299_v2  ;;  %302 = vst [vmem:[%s2129_s1 + $0x418] sm:$0xff] %v301_v3  ;;  %v305_v5 = vld [vmem:[%s2128_s0 + $0x428] sm:$0xff]  ;;  %v307_v6 = vld [vmem:[%s2128_s0 + $0x430] sm:$0xff] }
  0x44   :  { %304 = vst [vmem:[%s2129_s1 + $0x420] sm:$0xff] %v303_v4  ;;  %306 = vst [vmem:[%s2129_s1 + $0x428] sm:$0xff] %v305_v5  ;;  %v309_v7 = vld [vmem:[%s2128_s0 + $0x438] sm:$0xff]  ;;  %v311_v8 = vld [vmem:[%s2128_s0 + $0x440] sm:$0xff] }
  0x45   :  { %308 = vst [vmem:[%s2129_s1 + $0x430] sm:$0xff] %v307_v6  ;;  %v313_v9 = vld [vmem:[%s2128_s0 + $0x448] sm:$0xff]  ;;  %310 = vst [vmem:[%s2129_s1 + $0x438] sm:$0xff] %v309_v7  ;;  %v315_v10 = vld [vmem:[%s2128_s0 + $0x450] sm:$0xff] }
  0x46   :  { %312 = vst [vmem:[%s2129_s1 + $0x440] sm:$0xff] %v311_v8  ;;  %314 = vst [vmem:[%s2129_s1 + $0x448] sm:$0xff] %v313_v9  ;;  %v317_v11 = vld [vmem:[%s2128_s0 + $0x458] sm:$0xff]  ;;  %v319_v12 = vld [vmem:[%s2128_s0 + $0x460] sm:$0xff] }
  0x47   :  { %316 = vst [vmem:[%s2129_s1 + $0x450] sm:$0xff] %v315_v10  ;;  %318 = vst [vmem:[%s2129_s1 + $0x458] sm:$0xff] %v317_v11  ;;  %v321_v13 = vld [vmem:[%s2128_s0 + $0x468] sm:$0xff]  ;;  %v323_v14 = vld [vmem:[%s2128_s0 + $0x470] sm:$0xff] }
  0x48   :  { %320 = vst [vmem:[%s2129_s1 + $0x460] sm:$0xff] %v319_v12  ;;  %v325_v15 = vld [vmem:[%s2128_s0 + $0x478] sm:$0xff]  ;;  %322 = vst [vmem:[%s2129_s1 + $0x468] sm:$0xff] %v321_v13  ;;  %v327_v16 = vld [vmem:[%s2128_s0 + $0x480] sm:$0xff] }
  0x49   :  { %324 = vst [vmem:[%s2129_s1 + $0x470] sm:$0xff] %v323_v14  ;;  %326 = vst [vmem:[%s2129_s1 + $0x478] sm:$0xff] %v325_v15  ;;  %v329_v17 = vld [vmem:[%s2128_s0 + $0x488] sm:$0xff]  ;;  %v331_v18 = vld [vmem:[%s2128_s0 + $0x490] sm:$0xff] }
  0x4a   :  { %328 = vst [vmem:[%s2129_s1 + $0x480] sm:$0xff] %v327_v16  ;;  %330 = vst [vmem:[%s2129_s1 + $0x488] sm:$0xff] %v329_v17  ;;  %v333_v19 = vld [vmem:[%s2128_s0 + $0x498] sm:$0xff]  ;;  %v335_v20 = vld [vmem:[%s2128_s0 + $0x4a0] sm:$0xff] }
  0x4b   :  { %332 = vst [vmem:[%s2129_s1 + $0x490] sm:$0xff] %v331_v18  ;;  %v337_v21 = vld [vmem:[%s2128_s0 + $0x4a8] sm:$0xff]  ;;  %334 = vst [vmem:[%s2129_s1 + $0x498] sm:$0xff] %v333_v19  ;;  %v339_v22 = vld [vmem:[%s2128_s0 + $0x4b0] sm:$0xff] }
  0x4c   :  { %336 = vst [vmem:[%s2129_s1 + $0x4a0] sm:$0xff] %v335_v20  ;;  %338 = vst [vmem:[%s2129_s1 + $0x4a8] sm:$0xff] %v337_v21  ;;  %v341_v23 = vld [vmem:[%s2128_s0 + $0x4b8] sm:$0xff]  ;;  %v343_v24 = vld [vmem:[%s2128_s0 + $0x4c0] sm:$0xff] }
  0x4d   :  { %340 = vst [vmem:[%s2129_s1 + $0x4b0] sm:$0xff] %v339_v22  ;;  %342 = vst [vmem:[%s2129_s1 + $0x4b8] sm:$0xff] %v341_v23  ;;  %v345_v25 = vld [vmem:[%s2128_s0 + $0x4c8] sm:$0xff]  ;;  %v347_v26 = vld [vmem:[%s2128_s0 + $0x4d0] sm:$0xff] }
  0x4e   :  { %344 = vst [vmem:[%s2129_s1 + $0x4c0] sm:$0xff] %v343_v24  ;;  %v349_v27 = vld [vmem:[%s2128_s0 + $0x4d8] sm:$0xff]  ;;  %346 = vst [vmem:[%s2129_s1 + $0x4c8] sm:$0xff] %v345_v25  ;;  %v351_v28 = vld [vmem:[%s2128_s0 + $0x4e0] sm:$0xff] }
  0x4f   :  { %348 = vst [vmem:[%s2129_s1 + $0x4d0] sm:$0xff] %v347_v26  ;;  %350 = vst [vmem:[%s2129_s1 + $0x4d8] sm:$0xff] %v349_v27  ;;  %v353_v29 = vld [vmem:[%s2128_s0 + $0x4e8] sm:$0xff]  ;;  %v355_v30 = vld [vmem:[%s2128_s0 + $0x4f0] sm:$0xff] }
  0x50   :  { %352 = vst [vmem:[%s2129_s1 + $0x4e0] sm:$0xff] %v351_v28  ;;  %354 = vst [vmem:[%s2129_s1 + $0x4e8] sm:$0xff] %v353_v29  ;;  %v357_v31 = vld [vmem:[%s2128_s0 + $0x4f8] sm:$0xff]  ;;  %v359_v32 = vld [vmem:[%s2128_s0 + $0x500] sm:$0xff] }
  0x51   :  { %356 = vst [vmem:[%s2129_s1 + $0x4f0] sm:$0xff] %v355_v30  ;;  %v361_v33 = vld [vmem:[%s2128_s0 + $0x508] sm:$0xff]  ;;  %358 = vst [vmem:[%s2129_s1 + $0x4f8] sm:$0xff] %v357_v31  ;;  %v363_v34 = vld [vmem:[%s2128_s0 + $0x510] sm:$0xff] }
  0x52   :  { %360 = vst [vmem:[%s2129_s1 + $0x500] sm:$0xff] %v359_v32  ;;  %362 = vst [vmem:[%s2129_s1 + $0x508] sm:$0xff] %v361_v33  ;;  %v365_v35 = vld [vmem:[%s2128_s0 + $0x518] sm:$0xff]  ;;  %v367_v36 = vld [vmem:[%s2128_s0 + $0x520] sm:$0xff] }
  0x53   :  { %364 = vst [vmem:[%s2129_s1 + $0x510] sm:$0xff] %v363_v34  ;;  %366 = vst [vmem:[%s2129_s1 + $0x518] sm:$0xff] %v365_v35  ;;  %v369_v37 = vld [vmem:[%s2128_s0 + $0x528] sm:$0xff]  ;;  %v371_v38 = vld [vmem:[%s2128_s0 + $0x530] sm:$0xff] }
  0x54   :  { %368 = vst [vmem:[%s2129_s1 + $0x520] sm:$0xff] %v367_v36  ;;  %v373_v39 = vld [vmem:[%s2128_s0 + $0x538] sm:$0xff]  ;;  %370 = vst [vmem:[%s2129_s1 + $0x528] sm:$0xff] %v369_v37  ;;  %v375_v40 = vld [vmem:[%s2128_s0 + $0x540] sm:$0xff] }
  0x55   :  { %372 = vst [vmem:[%s2129_s1 + $0x530] sm:$0xff] %v371_v38  ;;  %374 = vst [vmem:[%s2129_s1 + $0x538] sm:$0xff] %v373_v39  ;;  %v377_v41 = vld [vmem:[%s2128_s0 + $0x548] sm:$0xff]  ;;  %v379_v42 = vld [vmem:[%s2128_s0 + $0x550] sm:$0xff] }
  0x56   :  { %376 = vst [vmem:[%s2129_s1 + $0x540] sm:$0xff] %v375_v40  ;;  %378 = vst [vmem:[%s2129_s1 + $0x548] sm:$0xff] %v377_v41  ;;  %v381_v43 = vld [vmem:[%s2128_s0 + $0x558] sm:$0xff]  ;;  %v383_v44 = vld [vmem:[%s2128_s0 + $0x560] sm:$0xff] }
  0x57   :  { %380 = vst [vmem:[%s2129_s1 + $0x550] sm:$0xff] %v379_v42  ;;  %v385_v45 = vld [vmem:[%s2128_s0 + $0x568] sm:$0xff]  ;;  %382 = vst [vmem:[%s2129_s1 + $0x558] sm:$0xff] %v381_v43  ;;  %v387_v46 = vld [vmem:[%s2128_s0 + $0x570] sm:$0xff] }
  0x58   :  { %384 = vst [vmem:[%s2129_s1 + $0x560] sm:$0xff] %v383_v44  ;;  %386 = vst [vmem:[%s2129_s1 + $0x568] sm:$0xff] %v385_v45  ;;  %v389_v47 = vld [vmem:[%s2128_s0 + $0x578] sm:$0xff]  ;;  %v391_v48 = vld [vmem:[%s2128_s0 + $0x580] sm:$0xff] }
  0x59   :  { %388 = vst [vmem:[%s2129_s1 + $0x570] sm:$0xff] %v387_v46  ;;  %390 = vst [vmem:[%s2129_s1 + $0x578] sm:$0xff] %v389_v47  ;;  %v393_v49 = vld [vmem:[%s2128_s0 + $0x588] sm:$0xff]  ;;  %v395_v50 = vld [vmem:[%s2128_s0 + $0x590] sm:$0xff] }
  0x5a   :  { %392 = vst [vmem:[%s2129_s1 + $0x580] sm:$0xff] %v391_v48  ;;  %v397_v51 = vld [vmem:[%s2128_s0 + $0x598] sm:$0xff]  ;;  %394 = vst [vmem:[%s2129_s1 + $0x588] sm:$0xff] %v393_v49  ;;  %v399_v52 = vld [vmem:[%s2128_s0 + $0x5a0] sm:$0xff] }
  0x5b   :  { %396 = vst [vmem:[%s2129_s1 + $0x590] sm:$0xff] %v395_v50  ;;  %398 = vst [vmem:[%s2129_s1 + $0x598] sm:$0xff] %v397_v51  ;;  %v401_v53 = vld [vmem:[%s2128_s0 + $0x5a8] sm:$0xff]  ;;  %v403_v54 = vld [vmem:[%s2128_s0 + $0x5b0] sm:$0xff] }
  0x5c   :  { %400 = vst [vmem:[%s2129_s1 + $0x5a0] sm:$0xff] %v399_v52  ;;  %402 = vst [vmem:[%s2129_s1 + $0x5a8] sm:$0xff] %v401_v53  ;;  %v405_v55 = vld [vmem:[%s2128_s0 + $0x5b8] sm:$0xff]  ;;  %v407_v56 = vld [vmem:[%s2128_s0 + $0x5c0] sm:$0xff] }
  0x5d   :  { %404 = vst [vmem:[%s2129_s1 + $0x5b0] sm:$0xff] %v403_v54  ;;  %v409_v57 = vld [vmem:[%s2128_s0 + $0x5c8] sm:$0xff]  ;;  %406 = vst [vmem:[%s2129_s1 + $0x5b8] sm:$0xff] %v405_v55  ;;  %v411_v58 = vld [vmem:[%s2128_s0 + $0x5d0] sm:$0xff] }
  0x5e   :  { %408 = vst [vmem:[%s2129_s1 + $0x5c0] sm:$0xff] %v407_v56  ;;  %410 = vst [vmem:[%s2129_s1 + $0x5c8] sm:$0xff] %v409_v57  ;;  %v413_v59 = vld [vmem:[%s2128_s0 + $0x5d8] sm:$0xff]  ;;  %v415_v60 = vld [vmem:[%s2128_s0 + $0x5e0] sm:$0xff] }
  0x5f   :  { %412 = vst [vmem:[%s2129_s1 + $0x5d0] sm:$0xff] %v411_v58  ;;  %414 = vst [vmem:[%s2129_s1 + $0x5d8] sm:$0xff] %v413_v59  ;;  %v417_v61 = vld [vmem:[%s2128_s0 + $0x5e8] sm:$0xff]  ;;  %v419_v62 = vld [vmem:[%s2128_s0 + $0x5f0] sm:$0xff] }
  0x60   :  { %416 = vst [vmem:[%s2129_s1 + $0x5e0] sm:$0xff] %v415_v60  ;;  %v421_v63 = vld [vmem:[%s2128_s0 + $0x5f8] sm:$0xff]  ;;  %418 = vst [vmem:[%s2129_s1 + $0x5e8] sm:$0xff] %v417_v61  ;;  %v423_v0 = vld [vmem:[%s2128_s0 + $0x600] sm:$0xff] }
  0x61   :  { %420 = vst [vmem:[%s2129_s1 + $0x5f0] sm:$0xff] %v419_v62  ;;  %422 = vst [vmem:[%s2129_s1 + $0x5f8] sm:$0xff] %v421_v63  ;;  %v425_v1 = vld [vmem:[%s2128_s0 + $0x608] sm:$0xff]  ;;  %v427_v2 = vld [vmem:[%s2128_s0 + $0x610] sm:$0xff] }
  0x62   :  { %424 = vst [vmem:[%s2129_s1 + $0x600] sm:$0xff] %v423_v0  ;;  %426 = vst [vmem:[%s2129_s1 + $0x608] sm:$0xff] %v425_v1  ;;  %v429_v3 = vld [vmem:[%s2128_s0 + $0x618] sm:$0xff]  ;;  %v431_v4 = vld [vmem:[%s2128_s0 + $0x620] sm:$0xff] }
  0x63   :  { %428 = vst [vmem:[%s2129_s1 + $0x610] sm:$0xff] %v427_v2  ;;  %v433_v5 = vld [vmem:[%s2128_s0 + $0x628] sm:$0xff]  ;;  %430 = vst [vmem:[%s2129_s1 + $0x618] sm:$0xff] %v429_v3  ;;  %v435_v6 = vld [vmem:[%s2128_s0 + $0x630] sm:$0xff] }
  0x64   :  { %432 = vst [vmem:[%s2129_s1 + $0x620] sm:$0xff] %v431_v4  ;;  %434 = vst [vmem:[%s2129_s1 + $0x628] sm:$0xff] %v433_v5  ;;  %v437_v7 = vld [vmem:[%s2128_s0 + $0x638] sm:$0xff]  ;;  %v439_v8 = vld [vmem:[%s2128_s0 + $0x640] sm:$0xff] }
  0x65   :  { %436 = vst [vmem:[%s2129_s1 + $0x630] sm:$0xff] %v435_v6  ;;  %438 = vst [vmem:[%s2129_s1 + $0x638] sm:$0xff] %v437_v7  ;;  %v441_v9 = vld [vmem:[%s2128_s0 + $0x648] sm:$0xff]  ;;  %v443_v10 = vld [vmem:[%s2128_s0 + $0x650] sm:$0xff] }
  0x66   :  { %440 = vst [vmem:[%s2129_s1 + $0x640] sm:$0xff] %v439_v8  ;;  %v445_v11 = vld [vmem:[%s2128_s0 + $0x658] sm:$0xff]  ;;  %442 = vst [vmem:[%s2129_s1 + $0x648] sm:$0xff] %v441_v9  ;;  %v447_v12 = vld [vmem:[%s2128_s0 + $0x660] sm:$0xff] }
  0x67   :  { %444 = vst [vmem:[%s2129_s1 + $0x650] sm:$0xff] %v443_v10  ;;  %446 = vst [vmem:[%s2129_s1 + $0x658] sm:$0xff] %v445_v11  ;;  %v449_v13 = vld [vmem:[%s2128_s0 + $0x668] sm:$0xff]  ;;  %v451_v14 = vld [vmem:[%s2128_s0 + $0x670] sm:$0xff] }
  0x68   :  { %448 = vst [vmem:[%s2129_s1 + $0x660] sm:$0xff] %v447_v12  ;;  %450 = vst [vmem:[%s2129_s1 + $0x668] sm:$0xff] %v449_v13  ;;  %v453_v15 = vld [vmem:[%s2128_s0 + $0x678] sm:$0xff]  ;;  %v455_v16 = vld [vmem:[%s2128_s0 + $0x680] sm:$0xff] }
  0x69   :  { %452 = vst [vmem:[%s2129_s1 + $0x670] sm:$0xff] %v451_v14  ;;  %v457_v17 = vld [vmem:[%s2128_s0 + $0x688] sm:$0xff]  ;;  %454 = vst [vmem:[%s2129_s1 + $0x678] sm:$0xff] %v453_v15  ;;  %v459_v18 = vld [vmem:[%s2128_s0 + $0x690] sm:$0xff] }
  0x6a   :  { %456 = vst [vmem:[%s2129_s1 + $0x680] sm:$0xff] %v455_v16  ;;  %458 = vst [vmem:[%s2129_s1 + $0x688] sm:$0xff] %v457_v17  ;;  %v461_v19 = vld [vmem:[%s2128_s0 + $0x698] sm:$0xff]  ;;  %v463_v20 = vld [vmem:[%s2128_s0 + $0x6a0] sm:$0xff] }
  0x6b   :  { %460 = vst [vmem:[%s2129_s1 + $0x690] sm:$0xff] %v459_v18  ;;  %462 = vst [vmem:[%s2129_s1 + $0x698] sm:$0xff] %v461_v19  ;;  %v465_v21 = vld [vmem:[%s2128_s0 + $0x6a8] sm:$0xff]  ;;  %v467_v22 = vld [vmem:[%s2128_s0 + $0x6b0] sm:$0xff] }
  0x6c   :  { %464 = vst [vmem:[%s2129_s1 + $0x6a0] sm:$0xff] %v463_v20  ;;  %v469_v23 = vld [vmem:[%s2128_s0 + $0x6b8] sm:$0xff]  ;;  %466 = vst [vmem:[%s2129_s1 + $0x6a8] sm:$0xff] %v465_v21  ;;  %v471_v24 = vld [vmem:[%s2128_s0 + $0x6c0] sm:$0xff] }
  0x6d   :  { %468 = vst [vmem:[%s2129_s1 + $0x6b0] sm:$0xff] %v467_v22  ;;  %470 = vst [vmem:[%s2129_s1 + $0x6b8] sm:$0xff] %v469_v23  ;;  %v473_v25 = vld [vmem:[%s2128_s0 + $0x6c8] sm:$0xff]  ;;  %v475_v26 = vld [vmem:[%s2128_s0 + $0x6d0] sm:$0xff] }
  0x6e   :  { %472 = vst [vmem:[%s2129_s1 + $0x6c0] sm:$0xff] %v471_v24  ;;  %474 = vst [vmem:[%s2129_s1 + $0x6c8] sm:$0xff] %v473_v25  ;;  %v477_v27 = vld [vmem:[%s2128_s0 + $0x6d8] sm:$0xff]  ;;  %v479_v28 = vld [vmem:[%s2128_s0 + $0x6e0] sm:$0xff] }
  0x6f   :  { %476 = vst [vmem:[%s2129_s1 + $0x6d0] sm:$0xff] %v475_v26  ;;  %v481_v29 = vld [vmem:[%s2128_s0 + $0x6e8] sm:$0xff]  ;;  %478 = vst [vmem:[%s2129_s1 + $0x6d8] sm:$0xff] %v477_v27  ;;  %v483_v30 = vld [vmem:[%s2128_s0 + $0x6f0] sm:$0xff] }
  0x70   :  { %480 = vst [vmem:[%s2129_s1 + $0x6e0] sm:$0xff] %v479_v28  ;;  %482 = vst [vmem:[%s2129_s1 + $0x6e8] sm:$0xff] %v481_v29  ;;  %v485_v31 = vld [vmem:[%s2128_s0 + $0x6f8] sm:$0xff]  ;;  %v487_v32 = vld [vmem:[%s2128_s0 + $0x700] sm:$0xff] }
  0x71   :  { %484 = vst [vmem:[%s2129_s1 + $0x6f0] sm:$0xff] %v483_v30  ;;  %486 = vst [vmem:[%s2129_s1 + $0x6f8] sm:$0xff] %v485_v31  ;;  %v489_v33 = vld [vmem:[%s2128_s0 + $0x708] sm:$0xff]  ;;  %v491_v34 = vld [vmem:[%s2128_s0 + $0x710] sm:$0xff] }
  0x72   :  { %488 = vst [vmem:[%s2129_s1 + $0x700] sm:$0xff] %v487_v32  ;;  %v493_v35 = vld [vmem:[%s2128_s0 + $0x718] sm:$0xff]  ;;  %490 = vst [vmem:[%s2129_s1 + $0x708] sm:$0xff] %v489_v33  ;;  %v495_v36 = vld [vmem:[%s2128_s0 + $0x720] sm:$0xff] }
  0x73   :  { %492 = vst [vmem:[%s2129_s1 + $0x710] sm:$0xff] %v491_v34  ;;  %494 = vst [vmem:[%s2129_s1 + $0x718] sm:$0xff] %v493_v35  ;;  %v497_v37 = vld [vmem:[%s2128_s0 + $0x728] sm:$0xff]  ;;  %v499_v38 = vld [vmem:[%s2128_s0 + $0x730] sm:$0xff] }
  0x74   :  { %496 = vst [vmem:[%s2129_s1 + $0x720] sm:$0xff] %v495_v36  ;;  %498 = vst [vmem:[%s2129_s1 + $0x728] sm:$0xff] %v497_v37  ;;  %v501_v39 = vld [vmem:[%s2128_s0 + $0x738] sm:$0xff]  ;;  %v503_v40 = vld [vmem:[%s2128_s0 + $0x740] sm:$0xff] }
  0x75   :  { %500 = vst [vmem:[%s2129_s1 + $0x730] sm:$0xff] %v499_v38  ;;  %v505_v41 = vld [vmem:[%s2128_s0 + $0x748] sm:$0xff]  ;;  %502 = vst [vmem:[%s2129_s1 + $0x738] sm:$0xff] %v501_v39  ;;  %v507_v42 = vld [vmem:[%s2128_s0 + $0x750] sm:$0xff] }
  0x76   :  { %504 = vst [vmem:[%s2129_s1 + $0x740] sm:$0xff] %v503_v40  ;;  %506 = vst [vmem:[%s2129_s1 + $0x748] sm:$0xff] %v505_v41  ;;  %v509_v43 = vld [vmem:[%s2128_s0 + $0x758] sm:$0xff]  ;;  %v511_v44 = vld [vmem:[%s2128_s0 + $0x760] sm:$0xff] }
  0x77   :  { %508 = vst [vmem:[%s2129_s1 + $0x750] sm:$0xff] %v507_v42  ;;  %510 = vst [vmem:[%s2129_s1 + $0x758] sm:$0xff] %v509_v43  ;;  %v513_v45 = vld [vmem:[%s2128_s0 + $0x768] sm:$0xff]  ;;  %v515_v46 = vld [vmem:[%s2128_s0 + $0x770] sm:$0xff] }
  0x78   :  { %512 = vst [vmem:[%s2129_s1 + $0x760] sm:$0xff] %v511_v44  ;;  %v517_v47 = vld [vmem:[%s2128_s0 + $0x778] sm:$0xff]  ;;  %514 = vst [vmem:[%s2129_s1 + $0x768] sm:$0xff] %v513_v45  ;;  %v519_v48 = vld [vmem:[%s2128_s0 + $0x780] sm:$0xff] }
  0x79   :  { %516 = vst [vmem:[%s2129_s1 + $0x770] sm:$0xff] %v515_v46  ;;  %518 = vst [vmem:[%s2129_s1 + $0x778] sm:$0xff] %v517_v47  ;;  %v521_v49 = vld [vmem:[%s2128_s0 + $0x788] sm:$0xff]  ;;  %v523_v50 = vld [vmem:[%s2128_s0 + $0x790] sm:$0xff] }
  0x7a   :  { %520 = vst [vmem:[%s2129_s1 + $0x780] sm:$0xff] %v519_v48  ;;  %522 = vst [vmem:[%s2129_s1 + $0x788] sm:$0xff] %v521_v49  ;;  %v525_v51 = vld [vmem:[%s2128_s0 + $0x798] sm:$0xff]  ;;  %v527_v52 = vld [vmem:[%s2128_s0 + $0x7a0] sm:$0xff] }
  0x7b   :  { %524 = vst [vmem:[%s2129_s1 + $0x790] sm:$0xff] %v523_v50  ;;  %v529_v53 = vld [vmem:[%s2128_s0 + $0x7a8] sm:$0xff]  ;;  %526 = vst [vmem:[%s2129_s1 + $0x798] sm:$0xff] %v525_v51  ;;  %v531_v54 = vld [vmem:[%s2128_s0 + $0x7b0] sm:$0xff] }
  0x7c   :  { %528 = vst [vmem:[%s2129_s1 + $0x7a0] sm:$0xff] %v527_v52  ;;  %530 = vst [vmem:[%s2129_s1 + $0x7a8] sm:$0xff] %v529_v53  ;;  %v533_v55 = vld [vmem:[%s2128_s0 + $0x7b8] sm:$0xff]  ;;  %v535_v56 = vld [vmem:[%s2128_s0 + $0x7c0] sm:$0xff] }
  0x7d   :  { %532 = vst [vmem:[%s2129_s1 + $0x7b0] sm:$0xff] %v531_v54  ;;  %534 = vst [vmem:[%s2129_s1 + $0x7b8] sm:$0xff] %v533_v55  ;;  %v537_v57 = vld [vmem:[%s2128_s0 + $0x7c8] sm:$0xff]  ;;  %v539_v58 = vld [vmem:[%s2128_s0 + $0x7d0] sm:$0xff] }
  0x7e   :  { %536 = vst [vmem:[%s2129_s1 + $0x7c0] sm:$0xff] %v535_v56  ;;  %v541_v59 = vld [vmem:[%s2128_s0 + $0x7d8] sm:$0xff]  ;;  %538 = vst [vmem:[%s2129_s1 + $0x7c8] sm:$0xff] %v537_v57  ;;  %v543_v60 = vld [vmem:[%s2128_s0 + $0x7e0] sm:$0xff] }
  0x7f   :  { %540 = vst [vmem:[%s2129_s1 + $0x7d0] sm:$0xff] %v539_v58  ;;  %542 = vst [vmem:[%s2129_s1 + $0x7d8] sm:$0xff] %v541_v59  ;;  %v545_v61 = vld [vmem:[%s2128_s0 + $0x7e8] sm:$0xff]  ;;  %v547_v62 = vld [vmem:[%s2128_s0 + $0x7f0] sm:$0xff] }
  0x80   :  { %544 = vst [vmem:[%s2129_s1 + $0x7e0] sm:$0xff] %v543_v60  ;;  %546 = vst [vmem:[%s2129_s1 + $0x7e8] sm:$0xff] %v545_v61  ;;  %v549_v63 = vld [vmem:[%s2128_s0 + $0x7f8] sm:$0xff] }
  0x81   :  { %548 = vst [vmem:[%s2129_s1 + $0x7f0] sm:$0xff] %v547_v62  ;;  %550 = vst [vmem:[%s2129_s1 + $0x7f8] sm:$0xff] %v549_v63 }
  0x82   :  { %558 = vsyncadd [#allocation2], 32768 }
  0x83   :  { %580 = dma.done.wait [#allocation2], 32768 }
  0x84   :  { %581 = vsyncadd [#allocation2], 4294934528 }
  0x85   :  { %565 = vsyncmov [#allocation2] }
  0x88   :  { %s566_s15 = vpop.sfrf %565 }
  0x89   :  { %p579_p0 = scmp.ne.s32.totalorder %s566_s15, 0 }
  0x8b   :  { %570 = shalt.err (%p579_p0)  }

</bundles_post_ra>
